<compile_context>
chip_gen: v6e
topology: v6e:2x2x1
jax: 0.10.0
libtpu: 0.0.40
codegen_flags: <defaults>
</compile_context>

<pallas_src>
import jax
import jax.numpy as jnp
from jax import lax
from jax.experimental import pallas as pl
from jax.experimental.pallas import tpu as pltpu


def _round_up(x, m):
    return ((x + m - 1) // m) * m


def _interp_kernel(pix_ref, bary_ref, attr_ref, out_ref, acc_ref):
    """One (pixel tile, face chunk) grid step.

    pix_ref : (1, TP)    int32    pix_to_face (-1 == background / padding)
    bary_ref: (3, TP)    float32  barycentric coordinates (vertex-major rows)
    attr_ref: (3D, FC)   bf16     attr_ref[v*D + d, f] = attrs[face_base + f, v, d]
    out_ref : (D, TP)    float32  transposed pixel values (lane-dense)
    acc_ref : (D, TP)    float32  VMEM accumulator across face chunks
    """
    k = pl.program_id(1)
    fc = attr_ref.shape[1]
    tp = pix_ref.shape[1]
    d = out_ref.shape[0]
    cdtype = attr_ref.dtype

    @pl.when(k == 0)
    def _():
        acc_ref[...] = jnp.zeros_like(acc_ref)

    pid = pix_ref[...]                                    # (1, TP) int32
    lo = k * fc
    in_chunk = (pid >= lo) & (pid < lo + fc)              # pid = -1 never hits

    # Skip face chunks that no pixel in this tile references.
    @pl.when(jnp.any(in_chunk))
    def _():
        rel = pid - lo                                    # (1, TP): cheap shift
        # k-invariant sublane iota; exact 0/1 hit matrix, cast once to bf16.
        hit = lax.broadcasted_iota(jnp.int32, (fc, tp), 0) == rel   # (FC, TP)
        hitf = hit.astype(cdtype)

        # One fused MXU matmul: (3D, FC) @ (FC, TP) -> (3D, TP), f32 accumulate.
        res = jnp.dot(attr_ref[...], hitf, preferred_element_type=jnp.float32)

        # Barycentric scaling commutes with the one-hot-column matmul; apply
        # it in f32 after the matmul (precision + no (FC,TP) selects).
        bary = bary_ref[...]                              # (3, TP) f32
        acc = acc_ref[...]
        for v in range(3):                                # static unroll
            acc = acc + bary[v:v + 1, :] * res[v * d:(v + 1) * d, :]
        acc_ref[...] = acc

    @pl.when(k == pl.num_programs(1) - 1)
    def _():
        out_ref[...] = acc_ref[...].astype(out_ref.dtype)


def interpolate_face_attributes(pix_to_face, barycentric_coords, face_attributes,
                                *, tile=1024, face_chunk=1024,
                                compute_dtype=jnp.bfloat16):
    """pixel_vals[n,h,w,k,d] = sum_v bary[n,h,w,k,v] * attrs[pix_to_face[n,h,w,k], v, d]
    with pix_to_face == -1 producing zeros (background)."""
    N, H, W, K = pix_to_face.shape
    F, three, D = face_attributes.shape
    assert three == 3
    P = N * H * W * K

    # Pixel tile: lane-dense, multiple of 256, no larger than the padded count.
    tile = max(256, (tile // 256) * 256)
    tile = min(tile, _round_up(P, 256))
    P_pad = _round_up(P, tile)

    # Face chunk: multiple of 256.  If the whole padded face table fits one
    # chunk, use a single chunk so the attr slab is DMA'd exactly once.
    face_chunk = max(256, (face_chunk // 256) * 256)
    F_pad_min = _round_up(F, 256)
    fc = F_pad_min if F_pad_min <= face_chunk else face_chunk
    F_pad = _round_up(F, fc)
    n_fchunks = F_pad // fc

    # Pixels on the lane axis.  Padded pixels get pid = -1 -> zero output.
    pix = pix_to_face.reshape(P).astype(jnp.int32)
    pix = jnp.pad(pix, (0, P_pad - P), constant_values=-1).reshape(1, P_pad)

    bc = barycentric_coords.reshape(P, 3).astype(jnp.float32)
    bc = jnp.pad(bc, ((0, P_pad - P), (0, 0))).T                     # (3, P_pad)

    # Fused attribute slab: attr_slab[v*D + d, f] = attrs[f, v, d]   (3D, F_pad)
    attr_slab = jnp.transpose(face_attributes.astype(compute_dtype), (1, 2, 0))
    attr_slab = attr_slab.reshape(3 * D, F)
    attr_slab = jnp.pad(attr_slab, ((0, 0), (0, F_pad - F)))

    # VMEM budget: double-buffered blocks + accumulator + in-kernel temporaries
    # (hit matrix + matmul result).  Capped well under v7x's 64 MiB physical.
    d8 = max(D, 8)
    blk_bytes = (2 * tile * 4 + 2 * 3 * tile * 4 + 2 * 3 * D * fc * 2
                 + 2 * d8 * tile * 4 + d8 * tile * 4)
    tmp_bytes = fc * tile * 8 + 3 * d8 * tile * 4
    vmem_limit = min(48 * 1024 * 1024,
                     max(32 * 1024 * 1024, int(1.25 * (blk_bytes + tmp_bytes))))

    out_t = pl.pallas_call(
        _interp_kernel,
        out_shape=jax.ShapeDtypeStruct((D, P_pad), jnp.float32),
        grid_spec=pltpu.PrefetchScalarGridSpec(
            num_scalar_prefetch=0,
            grid=(P_pad // tile, n_fchunks),                         # reduction last
            in_specs=[
                pl.BlockSpec((1, tile), lambda i, k: (0, i)),        # pix_to_face
                pl.BlockSpec((3, tile), lambda i, k: (0, i)),        # barycentrics
                pl.BlockSpec((3 * D, fc), lambda i, k: (0, k)),      # fused attrs
            ],
            out_specs=pl.BlockSpec((D, tile), lambda i, k: (0, i)),
            scratch_shapes=[pltpu.VMEM((D, tile), jnp.float32)],
        ),
        compiler_params=pltpu.CompilerParams(
            dimension_semantics=("parallel", "arbitrary"),
            vmem_limit_bytes=vmem_limit,
        ),
    )(pix, bc, attr_slab)

    return out_t.T[:P].reshape(N, H, W, K, D)


def _reference(pix_to_face, barycentric_coords, face_attributes):
    F = face_attributes.shape[0]
    gathered = jnp.where(
        (pix_to_face >= 0)[..., None, None],
        face_attributes[jnp.clip(pix_to_face, 0, F - 1)],            # (N,H,W,K,3,D)
        0.0,
    )
    return (gathered * barycentric_coords[..., None]).sum(axis=-2)


def _run_case(key, N, H, W, K, D, F, **kw):
    k1, k2, k3 = jax.random.split(key, 3)
    face_attributes = jax.random.normal(k1, (F, 3, D), dtype=jnp.float32)
    pix_to_face = jax.random.randint(k2, (N, H, W, K), -1, F, dtype=jnp.int32)
    raw = jax.random.uniform(k3, (N, H, W, K, 3), dtype=jnp.float32) + 1e-3
    barycentric_coords = raw / raw.sum(axis=-1, keepdims=True)

    pixel_vals = interpolate_face_attributes(
        pix_to_face, barycentric_coords, face_attributes, **kw)
    pixel_vals = jax.block_until_ready(pixel_vals)

    ref = _reference(pix_to_face, barycentric_coords, face_attributes)
    assert pixel_vals.shape == (N, H, W, K, D)
    # attrs are bf16 on the MXU (bary applied in f32) -> modest tolerance.
    assert jnp.allclose(pixel_vals, ref, atol=2e-2, rtol=2e-2), (
        float(jnp.max(jnp.abs(pixel_vals - ref))))
    return True


if __name__ == "__main__":
    key = jax.random.PRNGKey(0)
    kA, kB, kC = jax.random.split(key, 3)

    # Case 1: docstring-consistent small shapes; single pixel tile, single
    #         (VMEM-resident) face chunk.
    _run_case(kA, N=2, H=16, W=16, K=1, D=8, F=16)

    # Case 2: pixel-tail padding + multi-chunk face accumulator + chunk skip.
    _run_case(kB, N=2, H=9, W=9, K=1, D=8, F=700, tile=256, face_chunk=256)

    # Case 3: multiple pixel tiles with a single resident attr chunk
    #         (attr block index constant across the grid -> fetched once).
    _run_case(kC, N=2, H=32, W=32, K=1, D=8, F=300)

    print("KERNEL_OK")
</pallas_src>

<mosaic_0001>
module attributes {stable_mosaic.version = 11 : i64} {
  func.func @_interp_kernel(%arg0: i32, %arg1: i32, %arg2: memref<1x512xi32, #tpu.memory_space<vmem>>, %arg3: memref<3x512xf32, #tpu.memory_space<vmem>>, %arg4: memref<24x256xbf16, #tpu.memory_space<vmem>>, %arg5: memref<8x512xf32, #tpu.memory_space<vmem>>, %arg6: memref<8x512xf32, #tpu.memory_space<vmem>>) attributes {dimension_semantics = [#tpu.dimension_semantics<parallel>, #tpu.dimension_semantics<arbitrary>], iteration_bounds = array<i64: 1, 1>, scalar_prefetch = 0 : i64, scratch_operands = 1 : i64, tpu.core_type = #tpu.core_type<tc>, window_params = [{transform_indices = @transform_0, window_bounds = array<i64: 1, 512>}, {transform_indices = @transform_1, window_bounds = array<i64: 3, 512>}, {transform_indices = @transform_2, window_bounds = array<i64: 24, 256>}, {transform_indices = @transform_3, window_bounds = array<i64: 8, 512>}]} {
    %c0_i32 = arith.constant 0 : i32
    %0 = arith.cmpi eq, %arg1, %c0_i32 : i32
    %1 = arith.extui %0 : i1 to i32
    %c0_i32_0 = arith.constant 0 : i32
    %2 = arith.cmpi ne, %1, %c0_i32_0 : i32
    scf.if %2 {
      %cst_9 = arith.constant 0.000000e+00 : f32
      %24 = vector.broadcast %cst_9 : f32 to vector<8x512xf32>
      %c0_10 = arith.constant 0 : index
      %c0_11 = arith.constant 0 : index
      %25 = vector.load %arg6[%c0_10, %c0_11] : memref<8x512xf32, #tpu.memory_space<vmem>>, vector<8x512xf32>
      tpu.vector_store %arg6[%c0_10, %c0_11], %24 {strides = array<i32>} : memref<8x512xf32, #tpu.memory_space<vmem>>, vector<8x512xf32>,
    } else {
    }
    %c0 = arith.constant 0 : index
    %c0_1 = arith.constant 0 : index
    %3 = vector.load %arg2[%c0, %c0_1] : memref<1x512xi32, #tpu.memory_space<vmem>>, vector<1x512xi32>
    %c256_i32 = arith.constant 256 : i32
    %4 = arith.muli %arg1, %c256_i32 : i32
    %5 = vector.broadcast %4 : i32 to vector<1x512xi32>
    %6 = arith.cmpi sge, %3, %5 : vector<1x512xi32>
    %c256_i32_2 = arith.constant 256 : i32
    %7 = arith.addi %4, %c256_i32_2 : i32
    %8 = vector.broadcast %7 : i32 to vector<1x512xi32>
    %9 = arith.cmpi slt, %3, %8 : vector<1x512xi32>
    %10 = arith.andi %6, %9 : vector<1x512xi1>
    %cst = arith.constant 1.000000e+00 : f32
    %cst_3 = arith.constant 0.000000e+00 : f32
    %11 = vector.broadcast %cst : f32 to vector<1x512xf32>
    %12 = vector.broadcast %cst_3 : f32 to vector<1x512xf32>
    %13 = arith.select %10, %11, %12 : vector<1x512xi1>, vector<1x512xf32>
    %14 = vector.shape_cast %13 : vector<1x512xf32> to vector<1x1x512xf32>
    %cst_4 = arith.constant dense<0xFF800000> : vector<1xf32>
    %15 = vector.multi_reduction <maximumf>, %14, %cst_4 [1, 2] : vector<1x1x512xf32> to vector<1xf32>
    %16 = vector.shape_cast %15 : vector<1xf32> to vector<1x1x1xf32>
    %17 = vector.extract %16[0, 0, 0] : f32 from vector<1x1x1xf32>
    %cst_5 = arith.constant 0.000000e+00 : f32
    %18 = arith.cmpf ogt, %17, %cst_5 : f32
    %19 = arith.extui %18 : i1 to i32
    %c0_i32_6 = arith.constant 0 : i32
    %20 = arith.cmpi ne, %19, %c0_i32_6 : i32
    scf.if %20 {
      %24 = vector.broadcast %4 : i32 to vector<1x512xi32>
      %25 = arith.subi %3, %24 : vector<1x512xi32>
      %26 = tpu.iota {dimensions = array<i32: 0>} : vector<256x512xi32>
      %27 = vector.broadcast %25 : vector<1x512xi32> to vector<256x512xi32>
      %28 = arith.cmpi eq, %26, %27 : vector<256x512xi32>
      %29 = arith.extui %28 : vector<256x512xi1> to vector<256x512xi32>
      %30 = arith.sitofp %29 : vector<256x512xi32> to vector<256x512xf32>
      %31 = arith.truncf %30 : vector<256x512xf32> to vector<256x512xbf16>
      %c0_9 = arith.constant 0 : index
      %c0_10 = arith.constant 0 : index
      %32 = vector.load %arg4[%c0_9, %c0_10] : memref<24x256xbf16, #tpu.memory_space<vmem>>, vector<24x256xbf16>
      %cst_11 = arith.constant dense<0.000000e+00> : vector<24x512xf32>
      %33 = tpu.matmul %32, %31, %cst_11 {dimension_numbers = #tpu.dot_dimension_numbers<[1], [0], [0], [1], [0, 0, 1, 1], [], []>} : vector<24x256xbf16>, vector<256x512xbf16>, vector<24x512xf32> -> vector<24x512xf32>
      %c0_12 = arith.constant 0 : index
      %c0_13 = arith.constant 0 : index
      %34 = vector.load %arg3[%c0_12, %c0_13] : memref<3x512xf32, #tpu.memory_space<vmem>>, vector<3x512xf32>
      %c0_14 = arith.constant 0 : index
      %c0_15 = arith.constant 0 : index
      %35 = vector.load %arg6[%c0_14, %c0_15] : memref<8x512xf32, #tpu.memory_space<vmem>>, vector<8x512xf32>
      %36 = vector.extract_strided_slice %34 {offsets = [0, 0], sizes = [1, 512], strides = [1, 1]} : vector<3x512xf32> to vector<1x512xf32>
      %37 = vector.extract_strided_slice %33 {offsets = [0, 0], sizes = [8, 512], strides = [1, 1]} : vector<24x512xf32> to vector<8x512xf32>
      %38 = vector.broadcast %36 : vector<1x512xf32> to vector<8x512xf32>
      %39 = arith.mulf %38, %37 : vector<8x512xf32>
      %40 = arith.addf %35, %39 : vector<8x512xf32>
      %41 = vector.extract_strided_slice %34 {offsets = [1, 0], sizes = [1, 512], strides = [1, 1]} : vector<3x512xf32> to vector<1x512xf32>
      %42 = vector.extract_strided_slice %33 {offsets = [8, 0], sizes = [8, 512], strides = [1, 1]} : vector<24x512xf32> to vector<8x512xf32>
      %43 = vector.broadcast %41 : vector<1x512xf32> to vector<8x512xf32>
      %44 = arith.mulf %43, %42 : vector<8x512xf32>
      %45 = arith.addf %40, %44 : vector<8x512xf32>
      %46 = vector.extract_strided_slice %34 {offsets = [2, 0], sizes = [1, 512], strides = [1, 1]} : vector<3x512xf32> to vector<1x512xf32>
      %47 = vector.extract_strided_slice %33 {offsets = [16, 0], sizes = [8, 512], strides = [1, 1]} : vector<24x512xf32> to vector<8x512xf32>
      %48 = vector.broadcast %46 : vector<1x512xf32> to vector<8x512xf32>
      %49 = arith.mulf %48, %47 : vector<8x512xf32>
      %50 = arith.addf %45, %49 : vector<8x512xf32>
      %c0_16 = arith.constant 0 : index
      %c0_17 = arith.constant 0 : index
      %51 = vector.load %arg6[%c0_16, %c0_17] : memref<8x512xf32, #tpu.memory_space<vmem>>, vector<8x512xf32>
      tpu.vector_store %arg6[%c0_16, %c0_17], %50 {strides = array<i32>} : memref<8x512xf32, #tpu.memory_space<vmem>>, vector<8x512xf32>,
    } else {
    }
    %c0_i32_7 = arith.constant 0 : i32
    %21 = arith.cmpi eq, %arg1, %c0_i32_7 : i32
    %22 = arith.extui %21 : i1 to i32
    %c0_i32_8 = arith.constant 0 : i32
    %23 = arith.cmpi ne, %22, %c0_i32_8 : i32
    scf.if %23 {
      %c0_9 = arith.constant 0 : index
      %c0_10 = arith.constant 0 : index
      %24 = vector.load %arg6[%c0_9, %c0_10] : memref<8x512xf32, #tpu.memory_space<vmem>>, vector<8x512xf32>
      %c0_11 = arith.constant 0 : index
      %c0_12 = arith.constant 0 : index
      %25 = vector.load %arg5[%c0_11, %c0_12] : memref<8x512xf32, #tpu.memory_space<vmem>>, vector<8x512xf32>
      tpu.vector_store %arg5[%c0_11, %c0_12], %24 {strides = array<i32>} : memref<8x512xf32, #tpu.memory_space<vmem>>, vector<8x512xf32>,
    } else {
    }
    return
  }
  func.func @transform_0(%arg0: i32, %arg1: i32) -> (i32, i32) {
    %c0_i32 = arith.constant 0 : i32
    %c0_i32_0 = arith.constant 0 : i32
    return %c0_i32, %arg0 : i32, i32
  }
  func.func @transform_1(%arg0: i32, %arg1: i32) -> (i32, i32) {
    %c0_i32 = arith.constant 0 : i32
    %c0_i32_0 = arith.constant 0 : i32
    return %c0_i32, %arg0 : i32, i32
  }
  func.func @transform_2(%arg0: i32, %arg1: i32) -> (i32, i32) {
    %c0_i32 = arith.constant 0 : i32
    %c0_i32_0 = arith.constant 0 : i32
    return %c0_i32, %arg1 : i32, i32
  }
  func.func @transform_3(%arg0: i32, %arg1: i32) -> (i32, i32) {
    %c0_i32 = arith.constant 0 : i32
    %c0_i32_0 = arith.constant 0 : i32
    return %c0_i32, %arg0 : i32, i32
  }
}

</mosaic_0001>

<bundles_post_ra>
// kernel: tpu_custom_call.1
= control target key start
LH: loop header
LB: loop body
LE: loop exit
PB: predicated region body
PF: predicated region fallthrough
CT: control target
= control target key end

     0   :  { %8 = vsyncpa [#allocation4], 0  ;;  %s1577_s0 = inlined_call_operand.hbm [shape: s32[1,512], index: 0, kind: input, shape index: {}]   ;;  %s1578_s1 = inlined_call_operand.hbm [shape: f32[3,512], index: 1, kind: input, shape index: {}]   ;;  %s1579_s2 = inlined_call_operand.hbm [shape: bf16[24,256], index: 2, kind: input, shape index: {}]   ;;  %s1580_s3 = inlined_call_operand.hbm [shape: f32[8,512], index: 3, kind: output, shape index: {}]  }
   0x1   :  { %9 = vsyncpa [#allocation7], 0 }
   0x2   :  { %10 = vsyncpa [#allocation5], 0  ;;  %s1263_s12 = smov [#allocation6]   ;;  %s1264_s14 = smov [#allocation3]  }
   0x3   :  { %s27_s13 = sshll.u32 %s1263_s12, 4  ;;  %s17_s15 = sshll.u32 %s1264_s14, 4  ;;  %s28_s13 = int_to_ptr.vmem [resolvable:$true] %s27_s13  ;;  %s18_s15 = int_to_ptr.vmem [resolvable:$true] %s17_s15 }
   0x4   :  { %s1185_s16 = scalar_lea.vmem %s28_s13, 256  ;;  %p1190_p1 = scmp.lt.s32.totalorder %s28_s13, %s28_s13 }
   0x5   :  { %p1186_p0 = scmp.ne.s32.totalorder %s28_s13, %s1185_s16  ;;  %p1191_p2 = scmp.lt.s32.totalorder %s1185_s16, %s1185_s16 }
   0x7   :  { %p1192_p3 = por %p1191_p2, %p1190_p1 }
   0x9   :  { %p1193_p4 = pnand %p1192_p3, %p1186_p0 }
   0xb   :  { %1196 = shalt.err (!%p1193_p4)
}
   0xc   :  { %30 = dma.hbm_to_vmem [thread:$0]  %s1578_s1, 256, %s28_s13, [#allocation7]  }
   0xd   :  { %s1205_s19 = scalar_lea.vmem %s18_s15, 64  ;;  %p1210_p6 = scmp.lt.s32.totalorder %s18_s15, %s18_s15 }
   0xe   :  { %p1206_p5 = scmp.ne.s32.totalorder %s18_s15, %s1205_s19  ;;  %p1211_p7 = scmp.lt.s32.totalorder %s1205_s19, %s1205_s19 }
  0x10   :  { %p1212_p8 = por %p1211_p7, %p1210_p6 }
  0x12   :  { %p1213_p9 = pnand %p1212_p8, %p1206_p5 }
  0x14   :  { %1216 = shalt.err (!%p1213_p9)
}
  0x15   :  { %20 = dma.hbm_to_vmem [thread:$0]  %s1577_s0, 64, %s18_s15, [#allocation4]  }
  0x16   :  { %s1265_s22 = smov [#allocation8]  }
  0x17   :  { %s36_s23 = sshll.u32 %s1265_s22, 4  ;;  %s37_s23 = int_to_ptr.vmem [resolvable:$true] %s36_s23 }
  0x18   :  { %s1225_s24 = scalar_lea.vmem %s37_s23, 384  ;;  %p1230_p11 = scmp.lt.s32.totalorder %s37_s23, %s37_s23 }
  0x19   :  { %p1226_p10 = scmp.ne.s32.totalorder %s37_s23, %s1225_s24  ;;  %p1231_p12 = scmp.lt.s32.totalorder %s1225_s24, %s1225_s24 }
  0x1b   :  { %p1232_p13 = por %p1231_p12, %p1230_p11 }
  0x1d   :  { %p1233_p0 = pnand %p1232_p13, %p1226_p10 }
  0x1f   :  { %1236 = shalt.err (!%p1233_p0)
}
  0x20   :  { %s1266_s1 = smov 128   ;;  %s1267_s25 = smov 8  }
  0x21   :  { %42 = dma.hbm_to_vmem [thread:$0]  %s1579_s2, 384, %s37_s23, [#allocation7], %s1266_s1, %s1266_s1, %s1267_s25  }
  0x22   :  { %1257 = dma.done.wait [#allocation4], 64  }
  0x23   :  { %1258 = vsyncadd [#allocation4], 4294967232 }
  0x24   :  { %1259 = dma.done.wait [#allocation7], 640  }
  0x25   :  { %1260 = vsyncadd [#allocation7], 4294966656  ;;  %v70_v0 = vlaneseq  ;;  %v1268_v1 = vmov 0.0   ;;  %v60_v3 = vld [vmem:[#allocation3] sm:$0xf]  ;;  %vm90_vm3 = vcmask 1040384  }
  0x26   :  { %56 = vst [vmem:[#allocation2 + $0x10] sm:$0xff] %v1268_v1  ;;  %57 = vst [vmem:[#allocation2] sm:$0xff] %v1268_v1  ;;  %vm63_vm0 = vcmp.ge.s32.totalorder %v60_v3, 0  ;;  %vm66_vm1 = vcmp.lt.s32.totalorder %v60_v3, 256 }
  0x27   :  { %58 = vst [vmem:[#allocation2 + $0x18] sm:$0xff] %v1268_v1  ;;  %59 = vst [vmem:[#allocation2 + $0x8] sm:$0xff] %v1268_v1  ;;  %v1300_v2 = vshrl.u32 %v70_v0, 7 }
  0x28   :  { %vm67_vm2 = vmand %vm63_vm0, %vm66_vm1 }
  0x29   :  { %v1303_v4 = vsub.s32 0, %v1300_v2  ;;  %v1306_v5 = vsub.s32 1, %v1300_v2  ;;  %v1309_v6 = vsub.s32 2, %v1300_v2  ;;  %v84_v7 = vsub.s32 3, %v1300_v2 }
  0x2a   :  { %v68_v8 = vsel %vm67_vm2, 1.0, %v1268_v1 }
  0x2b   :  { %v73_v9 = vrot.slane %v68_v8, %v1303_v4  ;;  %v77_v10 = vrot.slane %v68_v8, %v1306_v5  ;;  %v81_v11 = vrot.slane %v68_v8, %v1309_v6  ;;  %v85_v12 = vrot.slane %v68_v8, %v84_v7 }
  0x2d   :  { %v91_v13 = vsel %vm90_vm3, %v73_v9, -inf  ;;  %v92_v14 = vsel %vm90_vm3, %v77_v10, -inf  ;;  %v93_v15 = vsel %vm90_vm3, %v81_v11, -inf  ;;  %v94_v16 = vsel %vm90_vm3, %v85_v12, -inf }
  0x2e   :  { %v95_v17 = vmax.f32 %v91_v13, %v92_v14  ;;  %v96_v18 = vmax.f32 %v93_v15, %v94_v16 }
  0x30   :  { %v97_v19 = vmax.f32 %v95_v17, %v96_v18 }
  0x32   :  { %98 = vmax.xlane.f32.xlu0 %v97_v19 }
  0xbb   :  { %v99_v20 = vpop.xlane.xlu0 %98 }
  0xbc   :  { %v100_v21 = vrot.slane %v99_v20, 4 }
  0xbe   :  { %v101_v22 = vmax.f32 %v99_v20, %v100_v21 }
  0xc0   :  { %v102_v23 = vrot.slane %v101_v22, 2 }
  0xc2   :  { %v103_v24 = vmax.f32 %v101_v22, %v102_v23 }
  0xc4   :  { %v104_v25 = vrot.slane %v103_v24, 1 }
  0xc6   :  { %v105_v26 = vmax.f32 %v103_v24, %v104_v25 }
  0xc8   :  { %1162 = vpush %v105_v26 }
  0xf9   :  { %s1163_s0 = spop %1162 }
  0xfa   :  { %p107_p1 = scmp.gt.f32.partialorder %s1163_s0, 0.0 }
  0xfb   :  { %v127_v27 = vadd.s32 (%p107_p1), 112, %v1300_v2  ;;  %v128_v28 = vadd.s32 (%p107_p1), 120, %v1300_v2  ;;  %v1318_v29 = vrot.slane (%p107_p1), %v60_v3, %v1306_v5  ;;  %v1320_v30 = vrot.slane (%p107_p1), %v60_v3, %v84_v7  ;;  %v1174_v34 = vld [vmem:[#allocation8 + $0x4] ss:$8 sps:$4 sm:$0xff] (%p107_p1)   ;;  %v611_v0 = vld [vmem:[#allocation8 + $0x10] sm:$0xff] (%p107_p1) }
  0xfc   :  { %110 = sbr.rel (!%p107_p1) target bundleno = 529 (0x211), region = 33  ;;  %v1323_v31 = vrot.slane (%p107_p1), %v60_v3, %v1303_v4  ;;  %v1326_v32 = vrot.slane (%p107_p1), %v60_v3, %v1309_v6  ;;  %v125_v33 = vadd.s32 (%p107_p1), 96, %v1300_v2  ;;  %v126_v35 = vadd.s32 (%p107_p1), 104, %v1300_v2  ;;  %661 = vmatprep.mubr.bf16.mxu0 (%p107_p1), %v1174_v34  ;;  %712 = vmatprep.mubr.bf16.mxu1 (%p107_p1), %v1174_v34  ;;  %v1172_v1 = vld [vmem:[#allocation8] ss:$8 sps:$4 sm:$0xff] (%p107_p1)  }
  0xfd   :  { %vm218_vm4 = vcmp.eq.s32.totalorder (%p107_p1), %v127_v27, %v1318_v29  ;;  %vm222_vm5 = vcmp.eq.s32.totalorder (%p107_p1), %v128_v28, %v1318_v29  ;;  %v123_v36 = vadd.s32 (%p107_p1), 80, %v1300_v2  ;;  %vm220_vm7 = vcmp.eq.s32.totalorder (%p107_p1), %v127_v27, %v1320_v30  ;;  %v731_v8 = vld [vmem:[#allocation6] sm:$0x77] (%p107_p1)  ;;  %v732_v9 = vld [vmem:[#allocation6 + $0x8] sm:$0x77] (%p107_p1) }
  0xfe   :  { %vm1034_vm6 = vmpackc.low (%p107_p1), %vm222_vm5, %vm218_vm4  ;;  %vm224_vm8 = vcmp.eq.s32.totalorder (%p107_p1), %v128_v28, %v1320_v30  ;;  %vm217_vm9 = vcmp.eq.s32.totalorder (%p107_p1), %v127_v27, %v1323_v31  ;;  %vm221_vm10 = vcmp.eq.s32.totalorder (%p107_p1), %v128_v28, %v1323_v31  ;;  %v1269_v37 = vmov (%p107_p1), 1.0|1.0  }
  0xff   :  { %1035 = vmatprep.subr.msk.bf16.mxu0 (%p107_p1), %vm1034_vm6, %v1269_v37  ;;  %vm1098_vm11 = vmpackc.low (%p107_p1), %vm224_vm8, %vm220_vm7  ;;  %vm219_vm12 = vcmp.eq.s32.totalorder (%p107_p1), %v127_v27, %v1326_v32  ;;  %vm223_vm13 = vcmp.eq.s32.totalorder (%p107_p1), %v128_v28, %v1326_v32  ;;  %vm210_vm14 = vcmp.eq.s32.totalorder (%p107_p1), %v125_v33, %v1318_v29  ;;  %vm214_vm15 = vcmp.eq.s32.totalorder (%p107_p1), %v126_v35, %v1318_v29 }
 0x100   :  { %1099 = vmatprep.subr.msk.bf16.mxu1 (%p107_p1), %vm1098_vm11, %v1269_v37  ;;  %vm1036_vm0 = vmpackc.low (%p107_p1), %vm221_vm10, %vm217_vm9  ;;  %vm212_vm1 = vcmp.eq.s32.totalorder (%p107_p1), %v125_v33, %v1320_v30  ;;  %vm216_vm2 = vcmp.eq.s32.totalorder (%p107_p1), %v126_v35, %v1320_v30  ;;  %vm209_vm4 = vcmp.eq.s32.totalorder (%p107_p1), %v125_v33, %v1323_v31  ;;  %vm213_vm5 = vcmp.eq.s32.totalorder (%p107_p1), %v126_v35, %v1323_v31 }
 0x101   :  { %1037 = vmatpush1.bf16.msk.msra.mxu0 %vm1036_vm0, %v1269_v37  ;;  %vm1100_vm3 = vmpackc.low %vm223_vm13, %vm219_vm12  ;;  %v124_v38 = vadd.s32 88, %v1300_v2  ;;  %vm211_vm7 = vcmp.eq.s32.totalorder %v125_v33, %v1326_v32  ;;  %vm215_vm8 = vcmp.eq.s32.totalorder %v126_v35, %v1326_v32  ;;  %vm202_vm10 = vcmp.eq.s32.totalorder %v123_v36, %v1318_v29  ;;  %v733_v35 = vld [vmem:[#allocation2 + $0x10] sm:$0xff] }
 0x102   :  { %1101 = vmatpush1.bf16.msk.msra.mxu1 %vm1100_vm3, %v1269_v37  ;;  %vm1038_vm6 = vmpackc.low %vm214_vm15, %vm210_vm14  ;;  %v121_v39 = vadd.s32 64, %v1300_v2  ;;  %vm204_vm13 = vcmp.eq.s32.totalorder %v123_v36, %v1320_v30  ;;  %v122_v40 = vadd.s32 72, %v1300_v2  ;;  %vm201_vm0 = vcmp.eq.s32.totalorder %v123_v36, %v1323_v31 }
 0x103   :  { %1039 = vmatprep.subr.msk.bf16.mxu0 %vm1038_vm6, %v1269_v37  ;;  %vm1102_vm9 = vmpackc.low %vm216_vm2, %vm212_vm1  ;;  %vm206_vm11 = vcmp.eq.s32.totalorder %v124_v38, %v1318_v29  ;;  %vm208_vm14 = vcmp.eq.s32.totalorder %v124_v38, %v1320_v30  ;;  %vm205_vm1 = vcmp.eq.s32.totalorder %v124_v38, %v1323_v31  ;;  %vm203_vm3 = vcmp.eq.s32.totalorder %v123_v36, %v1326_v32 }
 0x104   :  { %1103 = vmatprep.subr.msk.bf16.mxu1 %vm1102_vm9, %v1269_v37  ;;  %vm1040_vm12 = vmpackc.low %vm213_vm5, %vm209_vm4  ;;  %vm207_vm4 = vcmp.eq.s32.totalorder %v124_v38, %v1326_v32  ;;  %vm194_vm6 = vcmp.eq.s32.totalorder %v121_v39, %v1318_v29  ;;  %vm198_vm9 = vcmp.eq.s32.totalorder %v122_v40, %v1318_v29  ;;  %v119_v41 = vadd.s32 48, %v1300_v2 }
 0x105   :  { %1041 = vmatpush1.bf16.msk.msra.mxu0 %vm1040_vm12, %v1269_v37  ;;  %vm1104_vm15 = vmpackc.low %vm215_vm8, %vm211_vm7  ;;  %v120_v42 = vadd.s32 56, %v1300_v2  ;;  %vm196_vm8 = vcmp.eq.s32.totalorder %v121_v39, %v1320_v30  ;;  %vm193_vm12 = vcmp.eq.s32.totalorder %v121_v39, %v1323_v31  ;;  %v117_v43 = vadd.s32 32, %v1300_v2 }
 0x106   :  { %1105 = vmatpush1.bf16.msk.msra.mxu1 %vm1104_vm15, %v1269_v37  ;;  %vm1042_vm2 = vmpackc.low %vm206_vm11, %vm202_vm10  ;;  %vm200_vm10 = vcmp.eq.s32.totalorder %v122_v40, %v1320_v30  ;;  %vm195_vm15 = vcmp.eq.s32.totalorder %v121_v39, %v1326_v32  ;;  %v118_v44 = vadd.s32 40, %v1300_v2  ;;  %v115_v45 = vadd.s32 16, %v1300_v2 }
 0x107   :  { %1043 = vmatprep.subr.msk.bf16.mxu0 %vm1042_vm2, %v1269_v37  ;;  %vm1106_vm5 = vmpackc.low %vm208_vm14, %vm204_vm13  ;;  %vm197_vm13 = vcmp.eq.s32.totalorder %v122_v40, %v1323_v31  ;;  %vm199_vm2 = vcmp.eq.s32.totalorder %v122_v40, %v1326_v32  ;;  %v116_v46 = vadd.s32 24, %v1300_v2  ;;  %v114_v47 = vadd.s32 8, %v1300_v2  ;;  %v735_v40 = vld [vmem:[#allocation2 + $0x18] sm:$0xff] }
 0x108   :  { %1107 = vmatprep.subr.msk.bf16.mxu1 %vm1106_vm5, %v1269_v37  ;;  %vm1044_vm7 = vmpackc.low %vm205_vm1, %vm201_vm0  ;;  %vm186_vm1 = vcmp.eq.s32.totalorder %v119_v41, %v1318_v29  ;;  %vm190_vm5 = vcmp.eq.s32.totalorder %v120_v42, %v1318_v29  ;;  %v143_v48 = vadd.s32 240, %v1300_v2  ;;  %v144_v49 = vadd.s32 248, %v1300_v2 }
 0x109   :  { %1045 = vmatpush1.bf16.msk.msra.mxu0 %vm1044_vm7, %v1269_v37  ;;  %vm1108_vm11 = vmpackc.low %vm207_vm4, %vm203_vm3  ;;  %vm188_vm4 = vcmp.eq.s32.totalorder %v119_v41, %v1320_v30  ;;  %vm185_vm7 = vcmp.eq.s32.totalorder %v119_v41, %v1323_v31  ;;  %v141_v50 = vadd.s32 224, %v1300_v2  ;;  %v142_v51 = vadd.s32 232, %v1300_v2 }
 0x10a   :  { %1109 = vmatpush1.bf16.msk.msra.mxu1 %vm1108_vm11, %v1269_v37  ;;  %vm1046_vm14 = vmpackc.low %vm198_vm9, %vm194_vm6  ;;  %vm192_vm6 = vcmp.eq.s32.totalorder %v120_v42, %v1320_v30  ;;  %vm187_vm11 = vcmp.eq.s32.totalorder %v119_v41, %v1326_v32  ;;  %v139_v52 = vadd.s32 208, %v1300_v2  ;;  %v140_v53 = vadd.s32 216, %v1300_v2 }
 0x10b   :  { %1047 = vmatprep.subr.msk.bf16.mxu0 %vm1046_vm14, %v1269_v37  ;;  %vm1110_vm0 = vmpackc.low %vm200_vm10, %vm196_vm8  ;;  %vm189_vm8 = vcmp.eq.s32.totalorder %v120_v42, %v1323_v31  ;;  %vm191_vm14 = vcmp.eq.s32.totalorder %v120_v42, %v1326_v32  ;;  %v137_v54 = vadd.s32 192, %v1300_v2  ;;  %v138_v55 = vadd.s32 200, %v1300_v2 }
 0x10c   :  { %1111 = vmatprep.subr.msk.bf16.mxu1 %vm1110_vm0, %v1269_v37  ;;  %vm1048_vm3 = vmpackc.low %vm197_vm13, %vm193_vm12  ;;  %vm178_vm13 = vcmp.eq.s32.totalorder %v117_v43, %v1318_v29  ;;  %vm182_vm0 = vcmp.eq.s32.totalorder %v118_v44, %v1318_v29  ;;  %v135_v56 = vadd.s32 176, %v1300_v2  ;;  %v136_v57 = vadd.s32 184, %v1300_v2 }
 0x10d   :  { %1049 = vmatpush1.bf16.msk.msra.mxu0 %vm1048_vm3, %v1269_v37  ;;  %vm1112_vm9 = vmpackc.low %vm199_vm2, %vm195_vm15  ;;  %vm180_vm2 = vcmp.eq.s32.totalorder %v117_v43, %v1320_v30  ;;  %vm177_vm3 = vcmp.eq.s32.totalorder %v117_v43, %v1323_v31  ;;  %v133_v58 = vadd.s32 160, %v1300_v2  ;;  %v134_v59 = vadd.s32 168, %v1300_v2 }
 0x10e   :  { %1113 = vmatpush1.bf16.msk.msra.mxu1 %vm1112_vm9, %v1269_v37  ;;  %vm1050_vm10 = vmpackc.low %vm190_vm5, %vm186_vm1  ;;  %vm184_vm1 = vcmp.eq.s32.totalorder %v118_v44, %v1320_v30  ;;  %vm179_vm9 = vcmp.eq.s32.totalorder %v117_v43, %v1326_v32  ;;  %v131_v60 = vadd.s32 144, %v1300_v2  ;;  %v132_v61 = vadd.s32 152, %v1300_v2 }
 0x10f   :  { %1051 = vmatprep.subr.msk.bf16.mxu0 %vm1050_vm10, %v1269_v37  ;;  %vm1114_vm12 = vmpackc.low %vm192_vm6, %vm188_vm4  ;;  %vm181_vm4 = vcmp.eq.s32.totalorder %v118_v44, %v1323_v31  ;;  %vm183_vm10 = vcmp.eq.s32.totalorder %v118_v44, %v1326_v32  ;;  %v129_v62 = vadd.s32 128, %v1300_v2  ;;  %v130_v63 = vadd.s32 136, %v1300_v2  ;;  %v734_v44 = vld [vmem:[#allocation2] sm:$0xff] }
 0x110   :  { %1115 = vmatprep.subr.msk.bf16.mxu1 %vm1114_vm12, %v1269_v37  ;;  %vm1052_vm15 = vmpackc.low %vm189_vm8, %vm185_vm7  ;;  %vm170_vm8 = vcmp.eq.s32.totalorder %v115_v45, %v1318_v29  ;;  %vm174_vm12 = vcmp.eq.s32.totalorder %v116_v46, %v1318_v29  ;;  %v1033_v3 = vcombine.high %v611_v0, %v611_v0  ;;  %v1032_v7 = vcombine.low %v611_v0, %v611_v0 }
 0x111   :  { %1053 = vmatpush1.bf16.msk.msra.mxu0 %vm1052_vm15, %v1269_v37  ;;  %vm1116_vm5 = vmpackc.low %vm191_vm14, %vm187_vm11  ;;  %vm172_vm14 = vcmp.eq.s32.totalorder %v115_v45, %v1320_v30  ;;  %vm169_vm15 = vcmp.eq.s32.totalorder %v115_v45, %v1323_v31  ;;  %v745_v10 = vsub.s32 4, %v1300_v2  ;;  %v742_v11 = vrot.slane %v731_v8, %v1303_v4 }
 0x112   :  { %1117 = vmatpush1.bf16.msk.msra.mxu1 %vm1116_vm5, %v1269_v37  ;;  %vm1054_vm6 = vmpackc.low %vm182_vm0, %vm178_vm13  ;;  %vm176_vm13 = vcmp.eq.s32.totalorder %v116_v46, %v1320_v30  ;;  %vm171_vm5 = vcmp.eq.s32.totalorder %v115_v45, %v1326_v32  ;;  %v789_v12 = vsub.s32 5, %v1300_v2  ;;  %v750_v13 = vrot.slane %v732_v9, %v1303_v4 }
 0x113   :  { %1055 = vmatprep.subr.msk.bf16.mxu0 %vm1054_vm6, %v1269_v37  ;;  %vm1118_vm7 = vmpackc.low %vm184_vm1, %vm180_vm2  ;;  %vm173_vm2 = vcmp.eq.s32.totalorder %v116_v46, %v1323_v31  ;;  %vm175_vm6 = vcmp.eq.s32.totalorder %v116_v46, %v1326_v32  ;;  %v746_v14 = vrot.slane %v731_v8, %v745_v10  ;;  %v786_v15 = vrot.slane %v731_v8, %v1306_v5 }
 0x114   :  { %1119 = vmatprep.subr.msk.bf16.mxu1 %vm1118_vm7, %v1269_v37  ;;  %vm1056_vm11 = vmpackc.low %vm181_vm4, %vm177_vm3  ;;  %vm162_vm4 = vcmp.eq.s32.totalorder %v1300_v2, %v1318_v29  ;;  %vm166_vm7 = vcmp.eq.s32.totalorder %v114_v47, %v1318_v29  ;;  %v754_v16 = vrot.slane %v732_v9, %v745_v10  ;;  %v794_v17 = vrot.slane %v732_v9, %v1306_v5 }
 0x115   :  { %1057 = vmatpush1.bf16.msk.msra.mxu0 %vm1056_vm11, %v1269_v37  ;;  %vm1120_vm0 = vmpackc.low %vm183_vm10, %vm179_vm9  ;;  %vm164_vm10 = vcmp.eq.s32.totalorder %v1300_v2, %v1320_v30  ;;  %vm161_vm11 = vcmp.eq.s32.totalorder %v1300_v2, %v1323_v31  ;;  %v762_v18 = vrot.slane %v742_v11, %v1303_v4  ;;  %v790_v19 = vrot.slane %v731_v8, %v789_v12 }
 0x116   :  { %1121 = vmatpush1.bf16.msk.msra.mxu1 %vm1120_vm0, %v1269_v37  ;;  %vm1058_vm1 = vmpackc.low %vm174_vm12, %vm170_vm8  ;;  %vm168_vm8 = vcmp.eq.s32.totalorder %v114_v47, %v1320_v30  ;;  %vm163_vm0 = vcmp.eq.s32.totalorder %v1300_v2, %v1326_v32  ;;  %v833_v20 = vsub.s32 6, %v1300_v2  ;;  %v770_v22 = vrot.slane %v750_v13, %v1303_v4 }
 0x117   :  { %1059 = vmatprep.subr.msk.bf16.mxu0 %vm1058_vm1, %v1269_v37  ;;  %vm1122_vm3 = vmpackc.low %vm176_vm13, %vm172_vm14  ;;  %vm165_vm14 = vcmp.eq.s32.totalorder %v114_v47, %v1323_v31  ;;  %vm282_vm1 = vcmp.eq.s32.totalorder %v143_v48, %v1318_v29  ;;  %v798_v23 = vrot.slane %v732_v9, %v789_v12  ;;  %v766_v25 = vrot.slane %v746_v14, %v1303_v4 }
 0x118   :  { %1123 = vmatprep.subr.msk.bf16.mxu1 %vm1122_vm3, %v1269_v37  ;;  %vm1060_vm9 = vmpackc.low %vm173_vm2, %vm169_vm15  ;;  %vm167_vm15 = vcmp.eq.s32.totalorder %v114_v47, %v1326_v32  ;;  %vm284_vm3 = vcmp.eq.s32.totalorder %v143_v48, %v1320_v30  ;;  %v806_v26 = vrot.slane %v786_v15, %v1306_v5  ;;  %v830_v27 = vrot.slane %v731_v8, %v1309_v6 }
 0x119   :  { %1061 = vmatpush1.bf16.msk.msra.mxu0 %vm1060_vm9, %v1269_v37  ;;  %vm1124_vm12 = vmpackc.low %vm175_vm6, %vm171_vm5  ;;  %vm286_vm5 = vcmp.eq.s32.totalorder %v144_v49, %v1318_v29  ;;  %vm281_vm9 = vcmp.eq.s32.totalorder %v143_v48, %v1323_v31  ;;  %v810_v33 = vrot.slane %v790_v19, %v1306_v5  ;;  %v834_v34 = vrot.slane %v731_v8, %v833_v20 }
 0x11a   :  { %1125 = vmatpush1.bf16.msk.msra.mxu1 %vm1124_vm12, %v1269_v37  ;;  %vm1062_vm13 = vmpackc.low %vm166_vm7, %vm162_vm4  ;;  %vm288_vm4 = vcmp.eq.s32.totalorder %v144_v49, %v1320_v30  ;;  %vm283_vm12 = vcmp.eq.s32.totalorder %v143_v48, %v1326_v32  ;;  %v818_v38 = vrot.slane %v798_v23, %v1306_v5  ;;  %v842_v39 = vrot.slane %v732_v9, %v833_v20 }
 0x11b   :  { %1063 = vmatprep.subr.msk.bf16.mxu0 %vm1062_vm13, %v1269_v37  ;;  %vm1126_vm2 = vmpackc.low %vm168_vm8, %vm164_vm10  ;;  %vm285_vm10 = vcmp.eq.s32.totalorder %v144_v49, %v1323_v31  ;;  %vm287_vm13 = vcmp.eq.s32.totalorder %v144_v49, %v1326_v32 }
 0x11c   :  { %1127 = vmatprep.subr.msk.bf16.mxu1 %vm1126_vm2, %v1269_v37  ;;  %vm1064_vm6 = vmpackc.low %vm165_vm14, %vm161_vm11  ;;  %vm274_vm14 = vcmp.eq.s32.totalorder %v141_v50, %v1318_v29  ;;  %vm278_vm2 = vcmp.eq.s32.totalorder %v142_v51, %v1318_v29 }
 0x11d   :  { %1065 = vmatpush1.bf16.msk.msra.mxu0 %vm1064_vm6, %v1269_v37  ;;  %vm1128_vm7 = vmpackc.low %vm167_vm15, %vm163_vm0  ;;  %vm276_vm15 = vcmp.eq.s32.totalorder %v141_v50, %v1320_v30  ;;  %vm273_vm6 = vcmp.eq.s32.totalorder %v141_v50, %v1323_v31 }
 0x11e   :  { %1129 = vmatpush1.bf16.msk.msra.mxu1 %vm1128_vm7, %v1269_v37  ;;  %vm1066_vm8 = vmpackc.low %vm286_vm5, %vm282_vm1  ;;  %vm280_vm1 = vcmp.eq.s32.totalorder %v142_v51, %v1320_v30  ;;  %vm275_vm7 = vcmp.eq.s32.totalorder %v141_v50, %v1326_v32  ;;  %v736_v50 = vld [vmem:[#allocation2 + $0x8] sm:$0xff] }
 0x11f   :  { %1067 = vmatprep.subr.msk.bf16.mxu0 %vm1066_vm8, %v1269_v37  ;;  %vm1130_vm11 = vmpackc.low %vm288_vm4, %vm284_vm3  ;;  %vm277_vm3 = vcmp.eq.s32.totalorder %v142_v51, %v1323_v31  ;;  %vm279_vm8 = vcmp.eq.s32.totalorder %v142_v51, %v1326_v32 }
 0x120   :  { %1131 = vmatprep.subr.msk.bf16.mxu1 %vm1130_vm11, %v1269_v37  ;;  %vm1068_vm0 = vmpackc.low %vm285_vm10, %vm281_vm9  ;;  %vm266_vm10 = vcmp.eq.s32.totalorder %v139_v52, %v1318_v29  ;;  %vm270_vm11 = vcmp.eq.s32.totalorder %v140_v53, %v1318_v29 }
 0x121   :  { %1069 = vmatpush2.bf16.msk.msra.mxu0 %vm1068_vm0, %v1269_v37  ;;  %vm1132_vm5 = vmpackc.low %vm287_vm13, %vm283_vm12  ;;  %vm268_vm13 = vcmp.eq.s32.totalorder %v139_v52, %v1320_v30  ;;  %vm265_vm0 = vcmp.eq.s32.totalorder %v139_v52, %v1323_v31 }
 0x122   :  { %1133 = vmatpush2.bf16.msk.msra.mxu1 %vm1132_vm5, %v1269_v37  ;;  %vm1070_vm4 = vmpackc.low %vm278_vm2, %vm274_vm14  ;;  %vm272_vm14 = vcmp.eq.s32.totalorder %v140_v53, %v1320_v30  ;;  %vm267_vm5 = vcmp.eq.s32.totalorder %v139_v52, %v1326_v32 }
 0x123   :  { %1071 = vmatprep.subr.msk.bf16.mxu0 %vm1070_vm4, %v1269_v37  ;;  %vm1134_vm9 = vmpackc.low %vm280_vm1, %vm276_vm15  ;;  %vm269_vm15 = vcmp.eq.s32.totalorder %v140_v53, %v1323_v31  ;;  %vm271_vm4 = vcmp.eq.s32.totalorder %v140_v53, %v1326_v32  ;;  %v854_v53 = vrot.slane %v834_v34, %v1309_v6 }
 0x124   :  { %1135 = vmatprep.subr.msk.bf16.mxu1 %vm1134_vm9, %v1269_v37  ;;  %vm1072_vm12 = vmpackc.low %vm277_vm3, %vm273_vm6  ;;  %vm258_vm3 = vcmp.eq.s32.totalorder %v137_v54, %v1318_v29  ;;  %vm262_vm9 = vcmp.eq.s32.totalorder %v138_v55, %v1318_v29 }
 0x125   :  { %1073 = vmatpush2.bf16.msk.msra.mxu0 %vm1072_vm12, %v1269_v37  ;;  %vm1136_vm2 = vmpackc.low %vm279_vm8, %vm275_vm7  ;;  %vm260_vm8 = vcmp.eq.s32.totalorder %v137_v54, %v1320_v30  ;;  %vm257_vm12 = vcmp.eq.s32.totalorder %v137_v54, %v1323_v31 }
 0x126   :  { %1137 = vmatpush2.bf16.msk.msra.mxu1 %vm1136_vm2, %v1269_v37  ;;  %vm1074_vm1 = vmpackc.low %vm270_vm11, %vm266_vm10  ;;  %vm264_vm10 = vcmp.eq.s32.totalorder %v138_v55, %v1320_v30  ;;  %vm259_vm2 = vcmp.eq.s32.totalorder %v137_v54, %v1326_v32 }
 0x127   :  { %1075 = vmatprep.subr.msk.bf16.mxu0 %vm1074_vm1, %v1269_v37  ;;  %vm1138_vm6 = vmpackc.low %vm272_vm14, %vm268_vm13  ;;  %vm261_vm13 = vcmp.eq.s32.totalorder %v138_v55, %v1323_v31  ;;  %vm263_vm1 = vcmp.eq.s32.totalorder %v138_v55, %v1326_v32 }
 0x128   :  { %1139 = vmatprep.subr.msk.bf16.mxu1 %vm1138_vm6, %v1269_v37  ;;  %vm1076_vm7 = vmpackc.low %vm269_vm15, %vm265_vm0  ;;  %vm250_vm15 = vcmp.eq.s32.totalorder %v135_v56, %v1318_v29  ;;  %vm254_vm6 = vcmp.eq.s32.totalorder %v136_v57, %v1318_v29 }
 0x129   :  { %1077 = vmatpush2.bf16.msk.msra.mxu0 %vm1076_vm7, %v1269_v37  ;;  %vm1140_vm11 = vmpackc.low %vm271_vm4, %vm267_vm5  ;;  %vm252_vm4 = vcmp.eq.s32.totalorder %v135_v56, %v1320_v30  ;;  %vm249_vm7 = vcmp.eq.s32.totalorder %v135_v56, %v1323_v31 }
 0x12a   :  { %1141 = vmatpush2.bf16.msk.msra.mxu1 %vm1140_vm11, %v1269_v37  ;;  %vm1078_vm14 = vmpackc.low %vm262_vm9, %vm258_vm3  ;;  %vm256_vm3 = vcmp.eq.s32.totalorder %v136_v57, %v1320_v30  ;;  %vm251_vm11 = vcmp.eq.s32.totalorder %v135_v56, %v1326_v32  ;;  %v862_v56 = vrot.slane %v842_v39, %v1309_v6 }
 0x12b   :  { %1079 = vmatprep.subr.msk.bf16.mxu0 %vm1078_vm14, %v1269_v37  ;;  %vm1142_vm0 = vmpackc.low %vm264_vm10, %vm260_vm8  ;;  %vm253_vm8 = vcmp.eq.s32.totalorder %v136_v57, %v1323_v31  ;;  %vm255_vm14 = vcmp.eq.s32.totalorder %v136_v57, %v1326_v32 }
 0x12c   :  { %1143 = vmatprep.subr.msk.bf16.mxu1 %vm1142_vm0, %v1269_v37  ;;  %vm1080_vm5 = vmpackc.low %vm261_vm13, %vm257_vm12  ;;  %vm242_vm13 = vcmp.eq.s32.totalorder %v133_v58, %v1318_v29  ;;  %vm246_vm0 = vcmp.eq.s32.totalorder %v134_v59, %v1318_v29 }
 0x12d   :  { %1081 = vmatpush2.bf16.msk.msra.mxu0 %vm1080_vm5, %v1269_v37  ;;  %vm1144_vm9 = vmpackc.low %vm263_vm1, %vm259_vm2  ;;  %vm244_vm1 = vcmp.eq.s32.totalorder %v133_v58, %v1320_v30  ;;  %vm241_vm5 = vcmp.eq.s32.totalorder %v133_v58, %v1323_v31 }
 0x12e   :  { %1145 = vmatpush2.bf16.msk.msra.mxu1 %vm1144_vm9, %v1269_v37  ;;  %vm1082_vm10 = vmpackc.low %vm254_vm6, %vm250_vm15  ;;  %vm248_vm15 = vcmp.eq.s32.totalorder %v134_v59, %v1320_v30  ;;  %vm243_vm9 = vcmp.eq.s32.totalorder %v133_v58, %v1326_v32 }
 0x12f   :  { %1083 = vmatprep.subr.msk.bf16.mxu0 %vm1082_vm10, %v1269_v37  ;;  %vm1146_vm12 = vmpackc.low %vm256_vm3, %vm252_vm4  ;;  %vm245_vm4 = vcmp.eq.s32.totalorder %v134_v59, %v1323_v31  ;;  %vm247_vm10 = vcmp.eq.s32.totalorder %v134_v59, %v1326_v32 }
 0x130   :  { %1147 = vmatprep.subr.msk.bf16.mxu1 %vm1146_vm12, %v1269_v37  ;;  %vm1084_vm2 = vmpackc.low %vm253_vm8, %vm249_vm7  ;;  %vm234_vm8 = vcmp.eq.s32.totalorder %v131_v60, %v1318_v29  ;;  %vm238_vm12 = vcmp.eq.s32.totalorder %v132_v61, %v1318_v29 }
 0x131   :  { %1085 = vmatpush2.bf16.msk.msra.mxu0 %vm1084_vm2, %v1269_v37  ;;  %vm1148_vm6 = vmpackc.low %vm255_vm14, %vm251_vm11  ;;  %vm236_vm14 = vcmp.eq.s32.totalorder %v131_v60, %v1320_v30  ;;  %vm233_vm2 = vcmp.eq.s32.totalorder %v131_v60, %v1323_v31 }
 0x132   :  { %1149 = vmatpush2.bf16.msk.msra.mxu1 %vm1148_vm6, %v1269_v37  ;;  %vm1086_vm3 = vmpackc.low %vm246_vm0, %vm242_vm13  ;;  %vm240_vm13 = vcmp.eq.s32.totalorder %v132_v61, %v1320_v30  ;;  %vm235_vm6 = vcmp.eq.s32.totalorder %v131_v60, %v1326_v32 }
 0x133   :  { %1087 = vmatprep.subr.msk.bf16.mxu0 %vm1086_vm3, %v1269_v37  ;;  %vm1150_vm7 = vmpackc.low %vm248_vm15, %vm244_vm1  ;;  %vm237_vm1 = vcmp.eq.s32.totalorder %v132_v61, %v1323_v31  ;;  %vm239_vm3 = vcmp.eq.s32.totalorder %v132_v61, %v1326_v32 }
 0x134   :  { %1151 = vmatprep.subr.msk.bf16.mxu1 %vm1150_vm7, %v1269_v37  ;;  %vm1088_vm11 = vmpackc.low %vm245_vm4, %vm241_vm5  ;;  %vm226_vm4 = vcmp.eq.s32.totalorder %v129_v62, %v1318_v29  ;;  %vm230_vm7 = vcmp.eq.s32.totalorder %v130_v63, %v1318_v29  ;;  %v774_v29 = vrot.slane %v754_v16, %v1303_v4  ;;  %v850_v4 = vrot.slane %v830_v27, %v1309_v6 }
 0x135   :  { %1089 = vmatpush2.bf16.msk.msra.mxu0 %vm1088_vm11, %v1269_v37  ;;  %vm1152_vm0 = vmpackc.low %vm247_vm10, %vm243_vm9  ;;  %vm228_vm10 = vcmp.eq.s32.totalorder %v129_v62, %v1320_v30  ;;  %vm232_vm11 = vcmp.eq.s32.totalorder %v130_v63, %v1320_v30  ;;  %v814_v30 = vrot.slane %v794_v17, %v1306_v5 }
 0x136   :  { %1153 = vmatpush2.bf16.msk.msra.mxu1 %vm1152_vm0, %v1269_v37  ;;  %vm1090_vm15 = vmpackc.low %vm238_vm12, %vm234_vm8  ;;  %vm225_vm12 = vcmp.eq.s32.totalorder %v129_v62, %v1323_v31  ;;  %vm229_vm0 = vcmp.eq.s32.totalorder %v130_v63, %v1323_v31  ;;  %v838_v31 = vrot.slane %v732_v9, %v1309_v6 }
 0x137   :  { %1091 = vmatprep.subr.msk.bf16.mxu0 %vm1090_vm15, %v1269_v37  ;;  %vm1154_vm5 = vmpackc.low %vm240_vm13, %vm236_vm14  ;;  %vm227_vm13 = vcmp.eq.s32.totalorder %v129_v62, %v1326_v32  ;;  %vm231_vm15 = vcmp.eq.s32.totalorder %v130_v63, %v1326_v32 }
 0x138   :  { %1155 = vmatprep.subr.msk.bf16.mxu1 %vm1154_vm5, %v1269_v37  ;;  %vm1092_vm9 = vmpackc.low %vm237_vm1, %vm233_vm2  ;;  %v858_v48 = vrot.slane %v838_v31, %v1309_v6 }
 0x139   :  { %1093 = vmatpush2.bf16.msk.msra.mxu0 %vm1092_vm9, %v1269_v37  ;;  %vm1156_vm8 = vmpackc.low %vm239_vm3, %vm235_vm6 }
 0x13a   :  { %1157 = vmatpush2.bf16.msk.msra.mxu1 %vm1156_vm8, %v1269_v37  ;;  %vm1094_vm14 = vmpackc.low %vm230_vm7, %vm226_vm4 }
 0x13b   :  { %1095 = vmatprep.subr.msk.bf16.mxu0 %vm1094_vm14, %v1269_v37  ;;  %vm1158_vm2 = vmpackc.low %vm232_vm11, %vm228_vm10 }
 0x13c   :  { %1159 = vmatprep.subr.msk.bf16.mxu1 %vm1158_vm2, %v1269_v37  ;;  %vm1096_vm1 = vmpackc.low %vm229_vm0, %vm225_vm12 }
 0x13d   :  { %1097 = vmatpush2.bf16.msk.msra.mxu0 %vm1096_vm1, %v1269_v37  ;;  %vm1160_vm6 = vmpackc.low %vm231_vm15, %vm227_vm13 }
 0x13e   :  { %1161 = vmatpush2.bf16.msk.msra.mxu1 %vm1160_vm6, %v1269_v37 }
 0x140   :  { %662 = vmatmul.mubr.bf16.vlgmr.msra.gmra.mxu0 %v1172_v1 }
 0x141   :  { %713 = vmatmul.mubr.bf16.vlgmr.msra.gmra.mxu1 %v1172_v1  ;;  %671 = vmatprep.mubr.bf16.mxu0 %v1033_v3 }
 0x142   :  { %722 = vmatprep.mubr.bf16.mxu1 %v1033_v3 }
 0x148   :  { %672 = vmatmul.mubr.bf16.gmra.mxu0 %v1032_v7 }
 0x149   :  { %723 = vmatmul.mubr.bf16.gmra.mxu1 %v1032_v7 }
 0x200   :  { %v663_v21 = vpop.f32.mrf.mxu0 }
 0x201   :  { %v714_v24 = vpop.f32.mrf.mxu1  ;;  %v775_v32 = vmul.f32 %v762_v18, %v663_v21 }
 0x202   :  { %v665_v28 = vpop.f32.mrf.mxu0  ;;  %v777_v36 = vmul.f32 %v770_v22, %v714_v24 }
 0x203   :  { %v716_v2 = vpop.f32.mrf.mxu1  ;;  %v776_v41 = vmul.f32 %v766_v25, %v665_v28  ;;  %v779_v49 = vadd.f32 %v775_v32, %v733_v35 }
 0x204   :  { %v667_v37 = vpop.f32.mrf.mxu0  ;;  %v778_v45 = vmul.f32 %v774_v29, %v716_v2  ;;  %v781_v5 = vadd.f32 %v777_v36, %v735_v40 }
 0x205   :  { %v819_v42 = vmul.f32 %v806_v26, %v667_v37  ;;  %v718_v43 = vpop.f32.mrf.mxu1  ;;  %v780_v57 = vadd.f32 %v776_v41, %v734_v44 }
 0x206   :  { %v821_v46 = vmul.f32 %v814_v30, %v718_v43  ;;  %v669_v47 = vpop.f32.mrf.mxu0  ;;  %v782_v61 = vadd.f32 %v778_v45, %v736_v50 }
 0x207   :  { %v820_v51 = vmul.f32 %v810_v33, %v669_v47  ;;  %v720_v52 = vpop.f32.mrf.mxu1  ;;  %v823_v58 = vadd.f32 %v819_v42, %v779_v49 }
 0x208   :  { %v822_v54 = vmul.f32 %v818_v38, %v720_v52  ;;  %v673_v55 = vpop.f32.mrf.mxu0  ;;  %v825_v62 = vadd.f32 %v821_v46, %v781_v5 }
 0x209   :  { %v863_v59 = vmul.f32 %v850_v4, %v673_v55  ;;  %v724_v60 = vpop.f32.mrf.mxu1  ;;  %v824_v1 = vadd.f32 %v820_v51, %v780_v57 }
 0x20a   :  { %v865_v63 = vmul.f32 %v858_v48, %v724_v60  ;;  %v675_v0 = vpop.f32.mrf.mxu0  ;;  %v826_v9 = vadd.f32 %v822_v54, %v782_v61 }
 0x20b   :  { %v867_v3 = vadd.f32 %v863_v59, %v823_v58  ;;  %v864_v7 = vmul.f32 %v854_v53, %v675_v0  ;;  %v726_v8 = vpop.f32.mrf.mxu1 }
 0x20c   :  { %v869_v10 = vadd.f32 %v865_v63, %v825_v62  ;;  %v866_v11 = vmul.f32 %v862_v56, %v726_v8  ;;  %v677_v12 = vpop.f32.mrf.mxu0 }
 0x20d   :  { %871 = vst [vmem:[#allocation2 + $0x10] sm:$0xff] %v867_v3  ;;  %v868_v13 = vadd.f32 %v864_v7, %v824_v1  ;;  %v728_v14 = vpop.f32.mrf.mxu1 }
 0x20e   :  { %873 = vst [vmem:[#allocation2 + $0x18] sm:$0xff] %v869_v10  ;;  %v870_v6 = vadd.f32 %v866_v11, %v826_v9  ;;  %v678_v15 = vpop.f32.mrf.mxu0 }
 0x20f   :  { %872 = vst [vmem:[#allocation2] sm:$0xff] %v868_v13  ;;  %v729_v16 = vpop.f32.mrf.mxu1 }
 0x210   :  { %874 = vst [vmem:[#allocation2 + $0x8] sm:$0xff] %v870_v6 }
 0x211 PF:  { %s1270_s2 = smov [#allocation9]  }
 0x212   :  { %s892_s28 = sshll.u32 %s1270_s2, 4  ;;  %s893_s28 = int_to_ptr.vmem [resolvable:$true] %s892_s28 }
 0x213   :  { %s1237_s29 = scalar_lea.vmem %s893_s28, 512  ;;  %p1242_p3 = scmp.lt.s32.totalorder %s893_s28, %s893_s28 }
 0x214   :  { %v878_v17 = vld [vmem:[#allocation2 + $0x10] sm:$0xff]  ;;  %p1238_p2 = scmp.ne.s32.totalorder %s893_s28, %s1237_s29  ;;  %p1243_p4 = scmp.lt.s32.totalorder %s1237_s29, %s1237_s29 }
 0x215   :  { %v880_v19 = vld [vmem:[#allocation2 + $0x18] sm:$0xff]  ;;  %882 = vst [vmem:[#allocation9] sm:$0xff] %v878_v17 }
 0x216   :  { %v879_v18 = vld [vmem:[#allocation2] sm:$0xff]  ;;  %884 = vst [vmem:[#allocation9 + $0x10] sm:$0xff] %v880_v19  ;;  %p1244_p5 = por %p1243_p4, %p1242_p3 }
 0x217   :  { %883 = vst [vmem:[#allocation9 + $0x8] sm:$0xff] %v879_v18  ;;  %v881_v20 = vld [vmem:[#allocation2 + $0x8] sm:$0xff] }
 0x218   :  { %885 = vst [vmem:[#allocation9 + $0x18] sm:$0xff] %v881_v20  ;;  %p1245_p6 = pnand %p1244_p5, %p1238_p2 }
 0x21a   :  { %1248 = shalt.err (!%p1245_p6)
}
 0x21b   :  { %895 = dma.vmem_to_hbm [thread:$0]  %s893_s28, 512, %s1580_s3, [#allocation5]  }
 0x21c   :  { %1261 = dma.done.wait [#allocation5], 512  }
 0x21d   :  { %1262 = vsyncadd [#allocation5], 4294966784 }
 0x21e   :  { %899 = vsyncpa [#allocation4], 1 }
 0x21f   :  { %900 = vsyncpa [#allocation7], 1 }
 0x220   :  { %901 = vsyncpa [#allocation5], 1 }

</bundles_post_ra>
